<compile_context>
chip_gen: v7x
topology: tpu7x:2x2x1
jax: 0.10.0
libtpu: 0.0.40
codegen_flags: <defaults>
</compile_context>

<pallas_src>
import jax
import jax.numpy as jnp
from jax.experimental import pallas as pl
from jax.experimental.pallas import tpu as pltpu


def _inject_noise_kernel(x_ref, w_ref, n_ref, o_ref):
    # All operands arrive pre-cast to the same compute dtype; this is a pure
    # per-element FMA on the VPU: out = x + w * noise (w broadcasts over rows).
    x = x_ref[...]
    o_ref[...] = (x + w_ref[...] * n_ref[...]).astype(o_ref.dtype)


def inject_noise(x, weight, key, *, block_rows=None, donate_x=False,
                 return_noise=False):
    """out = x + weight * N(0, 1).

    x:      (B, C) activations (channels on the lane axis)
    weight: (1, C) learned per-channel scale
    key:    jax.random key used to draw the fresh Gaussian noise
    """
    B, C = x.shape
    assert weight.shape == (1, C)

    # Compute in x's dtype when it is floating (bf16 stays bf16 — noise
    # precision is irrelevant); otherwise fall back to f32.
    if jnp.issubdtype(x.dtype, jnp.floating):
        compute_dtype = x.dtype
    else:
        compute_dtype = jnp.float32

    noise = jax.random.normal(key, (B, C), dtype=compute_dtype)
    w = weight.astype(compute_dtype)

    itemsize = jnp.dtype(compute_dtype).itemsize
    # Packed-sublane multiple: 8 (f32), 16 (bf16/f16), 32 (int8/fp8).
    sublane = max(8, 32 // max(itemsize, 1))
    bytes_per_row = max(C * itemsize, 1)

    if block_rows is None:
        # ~6 MiB per streamed array per buffer.  3 streamed arrays
        # (x, noise, out), double-buffered -> <= ~36 MiB VMEM.
        block_rows = max(sublane, (6 * 1024 * 1024) // bytes_per_row)
    tb = min(int(block_rows), B)
    if tb < B:
        tb = max(sublane, (tb // sublane) * sublane)
    grid = (pl.cdiv(B, tb),)

    block_bytes = tb * C * itemsize
    # Double-buffered x / noise / out blocks + the resident (1, C) weight row,
    # with 50% headroom; capped comfortably below v7x's 64 MiB physical VMEM.
    vmem_needed = 2 * 3 * block_bytes + C * itemsize
    vmem_limit = int(min(max(int(1.5 * vmem_needed), 16 * 1024 * 1024),
                         56 * 1024 * 1024))

    tile_spec = pl.BlockSpec((tb, C), lambda i: (i, 0))
    w_spec = pl.BlockSpec((1, C), lambda i: (0, 0))

    extra = {}
    if donate_x:
        # Write the result in place over x (x is input 0).
        extra["input_output_aliases"] = {0: 0}

    out = pl.pallas_call(
        _inject_noise_kernel,
        out_shape=jax.ShapeDtypeStruct((B, C), x.dtype),
        grid=grid,
        in_specs=[tile_spec, w_spec, tile_spec],
        out_specs=tile_spec,
        compiler_params=pltpu.CompilerParams(
            dimension_semantics=("parallel",),   # shard row-tiles across TCs
            vmem_limit_bytes=vmem_limit,
        ),
        **extra,
    )(x, w, noise)

    if return_noise:
        return out, noise
    return out


if __name__ == "__main__":
    # Small but lane-dense, tile-aligned shapes: 32 rows x 256 channels.
    B, C = 32, 256
    key = jax.random.PRNGKey(0)
    k_x, k_w, k_n = jax.random.split(key, 3)

    x = jax.random.normal(k_x, (B, C), dtype=jnp.float32)
    # Module __init__ uses zeros(1, C); use a non-zero weight so the
    # multiply-add path is actually exercised (the zero init is tested below).
    weight = 0.1 * jax.random.normal(k_w, (1, C), dtype=jnp.float32)

    # block_rows=8 forces a 4-step grid so the pipelined path is exercised.
    out, noise = inject_noise(x, weight, k_n, block_rows=8, return_noise=True)
    out = jax.block_until_ready(out)
    noise = jax.block_until_ready(noise)

    assert out.shape == (B, C) and out.dtype == x.dtype
    assert noise.shape == (B, C)
    ref = x + weight * noise
    assert jnp.allclose(out, ref, atol=1e-6, rtol=1e-6)

    # Noise statistics: roughly standard normal, all finite.
    assert abs(float(jnp.mean(noise))) < 0.15
    assert abs(float(jnp.std(noise)) - 1.0) < 0.15
    assert bool(jnp.all(jnp.isfinite(noise)))

    # Determinism for a fixed key.
    out1 = jax.block_until_ready(inject_noise(x, weight, k_n))
    out2 = jax.block_until_ready(inject_noise(x, weight, k_n))
    assert jnp.array_equal(out1, out2)

    # Module's default init (weight = zeros) must return x unchanged.
    out0 = jax.block_until_ready(
        inject_noise(x, jnp.zeros((1, C), jnp.float32), k_n))
    assert jnp.array_equal(out0, x)

    # bf16 path: FMA stays in bf16, tile rounded to 16-row sublane multiples.
    x_bf = x.astype(jnp.bfloat16)
    out_bf, noise_bf = inject_noise(
        x_bf, weight, k_n, block_rows=16, return_noise=True)
    out_bf = jax.block_until_ready(out_bf)
    assert out_bf.dtype == jnp.bfloat16
    ref_bf = (x_bf + weight.astype(jnp.bfloat16) * noise_bf).astype(jnp.bfloat16)
    assert jnp.allclose(out_bf.astype(jnp.float32),
                        ref_bf.astype(jnp.float32), atol=3e-2, rtol=3e-2)

    print("KERNEL_OK")
</pallas_src>

<mosaic_0001>
module attributes {stable_mosaic.version = 11 : i64} {
  func.func @_inject_noise_kernel(%arg0: i32, %arg1: memref<8x256xf32, #tpu.memory_space<vmem>>, %arg2: memref<1x256xf32, #tpu.memory_space<vmem>>, %arg3: memref<8x256xf32, #tpu.memory_space<vmem>>, %arg4: memref<8x256xf32, #tpu.memory_space<vmem>>) attributes {dimension_semantics = [#tpu.dimension_semantics<parallel>], iteration_bounds = array<i64: 4>, scalar_prefetch = 0 : i64, scratch_operands = 0 : i64, tpu.core_type = #tpu.core_type<tc>, window_params = [{transform_indices = @transform_0, window_bounds = array<i64: 8, 256>}, {pipeline_mode = #tpu.pipeline_mode<synchronous>, transform_indices = @transform_1, window_bounds = array<i64: 1, 256>}, {transform_indices = @transform_2, window_bounds = array<i64: 8, 256>}, {transform_indices = @transform_3, window_bounds = array<i64: 8, 256>}]} {
    %c0 = arith.constant 0 : index
    %c0_0 = arith.constant 0 : index
    %0 = vector.load %arg1[%c0, %c0_0] : memref<8x256xf32, #tpu.memory_space<vmem>>, vector<8x256xf32>
    %c0_1 = arith.constant 0 : index
    %c0_2 = arith.constant 0 : index
    %1 = vector.load %arg2[%c0_1, %c0_2] : memref<1x256xf32, #tpu.memory_space<vmem>>, vector<1x256xf32>
    %c0_3 = arith.constant 0 : index
    %c0_4 = arith.constant 0 : index
    %2 = vector.load %arg3[%c0_3, %c0_4] : memref<8x256xf32, #tpu.memory_space<vmem>>, vector<8x256xf32>
    %3 = vector.broadcast %1 : vector<1x256xf32> to vector<8x256xf32>
    %4 = arith.mulf %3, %2 : vector<8x256xf32>
    %5 = arith.addf %0, %4 : vector<8x256xf32>
    %c0_5 = arith.constant 0 : index
    %c0_6 = arith.constant 0 : index
    %6 = vector.load %arg4[%c0_5, %c0_6] : memref<8x256xf32, #tpu.memory_space<vmem>>, vector<8x256xf32>
    tpu.vector_store %arg4[%c0_5, %c0_6], %5 {strides = array<i32>} : memref<8x256xf32, #tpu.memory_space<vmem>>, vector<8x256xf32>,
    return
  }
  func.func @transform_0(%arg0: i32) -> (i32, i32) {
    %c0_i32 = arith.constant 0 : i32
    %c0_i32_0 = arith.constant 0 : i32
    return %arg0, %c0_i32 : i32, i32
  }
  func.func @transform_1(%arg0: i32) -> (i32, i32) {
    %c0_i32 = arith.constant 0 : i32
    %c0_i32_0 = arith.constant 0 : i32
    %c0_i32_1 = arith.constant 0 : i32
    return %c0_i32, %c0_i32_0 : i32, i32
  }
  func.func @transform_2(%arg0: i32) -> (i32, i32) {
    %c0_i32 = arith.constant 0 : i32
    %c0_i32_0 = arith.constant 0 : i32
    return %arg0, %c0_i32 : i32, i32
  }
  func.func @transform_3(%arg0: i32) -> (i32, i32) {
    %c0_i32 = arith.constant 0 : i32
    %c0_i32_0 = arith.constant 0 : i32
    return %arg0, %c0_i32 : i32, i32
  }
}

</mosaic_0001>

<bundles_post_ra>
// kernel: tpu_custom_call.1
= control target key start
LH: loop header
LB: loop body
LE: loop exit
PB: predicated region body
PF: predicated region fallthrough
CT: control target
= control target key end

     0   :  { %8 = vsyncpa [#allocation3], 0  ;;  %s792_s0 = inlined_call_operand.hbm [shape: f32[32,256], index: 0, kind: input, shape index: {}]   ;;  %s793_s1 = inlined_call_operand.vmem [shape: f32[1,256], index: 1, kind: input, shape index: {}]   ;;  %s794_s2 = inlined_call_operand.hbm [shape: f32[32,256], index: 2, kind: input, shape index: {}]   ;;  %s795_s3 = inlined_call_operand.hbm [shape: f32[32,256], index: 3, kind: output, shape index: {}]  }
   0x1   :  { %10 = vsyncpa [#allocation3 + $0x1], 0 }
   0x2   :  { %11 = vsyncpa [#allocation6], 0 }
   0x3   :  { %13 = vsyncpa [#allocation6 + $0x1], 0 }
   0x4   :  { %14 = vsyncpa [#allocation4], 0 }
   0x5   :  { %16 = vsyncpa [#allocation4 + $0x1], 0  ;;  %s582_s12 = smov 0   ;;  %s584_s13 = smov 0  }
   0x6   :  { %s586_s14 = smov 0   ;;  %s588_s15 = smov 0  }
   0x7 LB: > { %s603_s16 = sadd.s32 4294967295, %s557_s15   ;;  %s355_s17 = sadd.s32 4294967294, %s557_s15   ;;  %s557_s15 = sphi %s588_s15, %s813_s15   ;;  %s553_s14 = sphi %s586_s14, %s812_s14   ;;  %s549_s13 = sphi %s584_s13, %s811_s13   ;;  %s545_s12 = sphi %s582_s12, %s810_s12  }
   0x8   : > { %s607_s18 = sadd.s32 1, %s557_s15   ;;  %s29_s19 = sadd.s32 1, %s553_s14 }
   0x9   : > { %s26_s20 = ssub.s32 %s557_s15, %s607_s18  ;;  %p36_p0 = scmp.ne.s32.totalorder %s553_s14, %s549_s13 }
   0xa   : > { %p27_p1 = scmp.eq.s32.totalorder %s26_s20, 0  ;;  %p37_p2 = scmp.eq.s32.totalorder %s557_s15, 0 }
   0xb   : > { %p42_p3 = scmp.ne.s32.totalorder %s549_s13, %s545_s12  ;;  %p43_p4 = scmp.eq.s32.totalorder %s603_s16, 0 }
   0xc   : > { %s619_s21 = scalar_select %p27_p1, %s553_s14, %s29_s19  }
   0xd   : > { %p621_p5 = por %p37_p2, %p36_p0  ;;  %p625_p6 = por %p43_p4, %p42_p3 }
   0xe   : > { %p113_p7 = scmp.eq.s32.totalorder %s603_s16, 3  ;;  %p119_p8 = scmp.eq.s32.totalorder %s355_s17, 3 }
   0xf   : > { %s799_s23 = scalar_select %p625_p6, 1, 0 }
  0x10   : > { %p393_p9 = scmp.lt.s32.totalorder %s557_s15, 4  ;;  %p631_p10 = por %p113_p7, %p36_p0 }
  0x11   : > { %p635_p11 = por %p119_p8, %p42_p3  ;;  %s640_s26 = sand.u32 1, %s553_s14  }
  0x12   : > { %s800_s24 = scalar_select %p631_p10, 1, 0 }
  0x13   : > { %s801_s25 = scalar_select %p635_p11, 1, 0 }
  0x14   : > { %s373_s27 = sshll.u32 %s557_s15, 8  ;;  %s358_s28 = sshll.u32 %s640_s26, 4 }
  0x15   : > { %s649_s4 = scalar_lea.hbm %s792_s0, %s373_s27  ;;  %s146_s5 = scalar_lea.vmem [#allocation2], %s358_s28 }
  0x16   : > { %s154_s6 = sshll.u32 %s146_s5, 4  ;;  %p655_p12 = pnand %p393_p9, %p621_p5  ;;  %s659_s6 = int_to_ptr.vmem [resolvable:$true] %s154_s6 }
  0x17   : > { %s143_s8 = scalar_lea.sflag [#allocation3], %s640_s26  ;;  %s427_s9 = scalar_lea.hbm %s649_s4, 256 }
  0x18   : > { %p428_p1 = scmp.ne.s32.totalorder %s649_s4, %s427_s9  ;;  %p429_p2 = pneg %p655_p12 }
  0x19   : > { %s432_s17 = scalar_lea.hbm %s792_s0, 1024  ;;  %p433_p5 = scmp.lt.u32.totalorder %s649_s4, %s792_s0 }
  0x1a   : > { %p430_p3 = pnand %p429_p2, %p428_p1  ;;  %p434_p7 = scmp.lt.u32.totalorder %s432_s17, %s427_s9 }
  0x1b   : > { %p436_p9 = scmp.lt.u32.totalorder %s427_s9, %s649_s4 }
  0x1c   : > { %p431_p4 = pneg %p430_p3  ;;  %p435_p8 = por %p434_p7, %p433_p5 }
  0x1e   : > { %p437_p13 = por %p436_p9, %p435_p8 }
  0x20   : > { %p438_p0 = pnand %p437_p13, %p431_p4 }
  0x22   : > { %441 = shalt.err (!%p438_p0)
}
  0x23   : > { %s442_s22 = scalar_lea.vmem %s659_s6, 256  ;;  %s559_s29 = smov [#allocation2]  }
  0x24   : > { %p443_p1 = scmp.ne.s32.totalorder %s659_s6, %s442_s22  ;;  %s447_s30 = sshll.u32 %s559_s29, 4  ;;  %s448_s30 = int_to_ptr.vmem [resolvable:$false] %s447_s30 }
  0x25   : > { %s449_s5 = scalar_lea.vmem %s448_s30, 512  ;;  %p450_p10 = scmp.lt.s32.totalorder %s659_s6, %s448_s30 }
  0x26   : > { %p445_p3 = pnand %p443_p1, %p429_p2  ;;  %p451_p5 = scmp.lt.s32.totalorder %s449_s5, %s442_s22 }
  0x28   : > { %p446_p11 = pneg %p445_p3  ;;  %p452_p7 = por %p451_p5, %p450_p10 }
  0x2a   : > { %p453_p8 = pnand %p452_p7, %p446_p11 }
  0x2c   : > { %456 = shalt.err (!%p453_p8)
}
  0x2d   : > { %385 = dma.hbm_to_vmem [thread:$0]  (!%p655_p12), %s649_s4, 256, %s659_s6, %s143_s8  }
  0x2e   : > { %p803_p13 = scmp.lt.s32.totalorder %s557_s15, 5  ;;  %p804_p0 = scmp.ge.s32.totalorder %s557_s15, 1 }
  0x2f   : > { %s702_s17 = scalar_lea.hbm %s794_s2, %s373_s27  ;;  %s165_s19 = scalar_lea.vmem [#allocation5], %s358_s28 }
  0x30   : > { %p693_p4 = pnand %p804_p0, %p803_p13  ;;  %s173_s20 = sshll.u32 %s165_s19, 4  ;;  %s174_s20 = int_to_ptr.vmem [resolvable:$true] %s173_s20 }
  0x31   : > { %s162_s4 = scalar_lea.sflag [#allocation6], %s640_s26  ;;  %s457_s6 = scalar_lea.hbm %s702_s17, 256 }
  0x32   : > { %s805_s9 = scalar_select %p693_p4, 1, 0 }
  0x33   : > { %p458_p10 = scmp.ne.s32.totalorder %s702_s17, %s457_s6  ;;  %s462_s27 = scalar_lea.hbm %s794_s2, 1024 }
  0x34   : > { %p463_p1 = scmp.lt.u32.totalorder %s702_s17, %s794_s2  ;;  %p464_p3 = scmp.lt.u32.totalorder %s462_s27, %s457_s6 }
  0x35   : > { %p460_p11 = pnand %p458_p10, %p429_p2  ;;  %p466_p7 = scmp.lt.u32.totalorder %s457_s6, %s702_s17 }
  0x36   : > { %p465_p5 = por %p464_p3, %p463_p1 }
  0x37   : > { %p461_p9 = pneg %p460_p11 }
  0x38   : > { %p467_p8 = por %p466_p7, %p465_p5 }
  0x3a   : > { %p468_p13 = pnand %p467_p8, %p461_p9 }
  0x3c   : > { %471 = shalt.err (!%p468_p13)
}
  0x3d   : > { %s472_s26 = scalar_lea.vmem %s174_s20, 256  ;;  %s560_s28 = smov [#allocation5]  }
  0x3e   : > { %p473_p0 = scmp.ne.s32.totalorder %s174_s20, %s472_s26  ;;  %s477_s5 = sshll.u32 %s560_s28, 4  ;;  %s478_s5 = int_to_ptr.vmem [resolvable:$false] %s477_s5 }
  0x3f   : > { %s479_s10 = scalar_lea.vmem %s478_s5, 512  ;;  %p480_p6 = scmp.lt.s32.totalorder %s174_s20, %s478_s5 }
  0x40   : > { %p475_p10 = pnand %p473_p0, %p429_p2  ;;  %p481_p4 = scmp.lt.s32.totalorder %s479_s10, %s472_s26 }
  0x42   : > { %p476_p11 = pneg %p475_p10  ;;  %p482_p1 = por %p481_p4, %p480_p6 }
  0x44   : > { %p483_p3 = pnand %p482_p1, %p476_p11 }
  0x46   : > { %486 = shalt.err (!%p483_p3)
}
  0x47   : > { %388 = dma.hbm_to_vmem [thread:$0]  (!%p655_p12), %s702_s17, 256, %s174_s20, %s162_s4  }
  0x48   : > { %p806_p9 = scmp.ne.s32.totalorder %s805_s9, 0 }
  0x49   : > { %s729_s11 = sand.u32 (!%p806_p9), 1, %s549_s13   ;;  %p807_p2 = scmp.ne.s32.totalorder (!%p806_p9), %s799_s23, 0 }
  0x4a   : > { %182 = sbr.rel (%p806_p9) target bundleno = 110 (0x6e), region = 32  ;;  %s365_s19 = sshll.u32 (!%p806_p9), %s729_s11, 4 }
  0x4b   : > { %s185_s6 = scalar_lea.sflag (!%p806_p9), [#allocation3], %s729_s11  ;;  %s188_s8 = scalar_lea.vmem (!%p806_p9), [#allocation2], %s365_s19 }
  0x51   : > { %532 = dma.done.wait (%p807_p2), %s185_s6, 256  }
  0x52   : > { %534 = vsyncadd (%p807_p2), %s185_s6, 4294967040  ;;  %s194_s7 = scalar_lea.sflag [#allocation6], %s729_s11  ;;  %s197_s17 = scalar_lea.vmem [#allocation5], %s365_s19 }
  0x53   : > { %536 = dma.done.wait (%p807_p2), %s194_s7, 256  }
  0x54   : > { %538 = vsyncadd (%p807_p2), %s194_s7, 4294967040  ;;  %v231_v0 = vlaneseq  ;;  %v227_v4 = vld [vmem:[%s793_s1] sm:$0x3]  ;;  %v229_v7 = vld [vmem:[%s197_s17 + $0x8] sm:$0xff]  ;;  %s224_s4 = scalar_lea.vmem [#allocation7], %s365_s19  ;;  %s375_s23 = sshll.u32 %s603_s16, 8 }
  0x55   : > { %v228_v5 = vld [vmem:[%s197_s17] sm:$0xff]  ;;  %s262_s22 = sshll.u32 %s224_s4, 4  ;;  %v226_v10 = vld [vmem:[%s188_s8 + $0x8] sm:$0xff]  ;;  %s751_s30 = scalar_lea.hbm %s795_s3, %s375_s23  ;;  %s746_s22 = int_to_ptr.vmem [resolvable:$true] %s262_s22 }
  0x56   : > { %v232_v1 = vshrl.u32 %v231_v0, 7  ;;  %v225_v9 = vld [vmem:[%s188_s8] sm:$0xff]  ;;  %s248_s26 = scalar_lea.sflag [#allocation4], %s729_s11  ;;  %s487_s28 = scalar_lea.vmem %s746_s22, 256 }
  0x57   : > { %p488_p6 = scmp.ne.s32.totalorder %s746_s22, %s487_s28  ;;  %p808_p12 = scmp.ne.s32.totalorder %s800_s24, 0 }
  0x58   : > { %v233_v2 = vsub.s32 0, %v232_v1  ;;  %v237_v3 = vsub.s32 1, %v232_v1  ;;  %s561_s16 = smov [#allocation7]  }
  0x59   : > { %p489_p4 = pnand %p488_p6, %p808_p12  ;;  %s491_s5 = sshll.u32 %s561_s16, 4  ;;  %s492_s5 = int_to_ptr.vmem [resolvable:$false] %s491_s5 }
  0x5a   : > { %v234_v6 = vrot.slane %v227_v4, %v233_v2  ;;  %v238_v8 = vrot.slane %v227_v4, %v237_v3  ;;  %s493_s10 = scalar_lea.vmem %s492_s5, 512  ;;  %p494_p7 = scmp.lt.s32.totalorder %s746_s22, %s492_s5 }
  0x5b   : > { %p490_p5 = pneg %p489_p4  ;;  %p495_p8 = scmp.lt.s32.totalorder %s493_s10, %s487_s28 }
  0x5c   : > { %v241_v11 = vmul.f32 %v234_v6, %v228_v5  ;;  %v242_v12 = vmul.f32 %v238_v8, %v229_v7 }
  0x5d   : > { %p496_p13 = por %p495_p8, %p494_p7 }
  0x5e   : > { %v243_v13 = vadd.f32 %v241_v11, %v225_v9  ;;  %v244_v14 = vadd.f32 %v242_v12, %v226_v10 }
  0x5f   : > { %p497_p0 = pnand %p496_p13, %p490_p5 }
  0x60   : > { %245 = vst [vmem:[%s224_s4] sm:$0xff] %v243_v13  ;;  %246 = vst [vmem:[%s224_s4 + $0x8] sm:$0xff] %v244_v14 }
  0x61   : > { %500 = shalt.err (!%p497_p0)
}
  0x62   : > { %s501_s11 = scalar_lea.hbm %s751_s30, 256  ;;  %s505_s8 = scalar_lea.hbm %s795_s3, 1024 }
  0x63   : > { %p502_p10 = scmp.ne.s32.totalorder %s751_s30, %s501_s11  ;;  %p506_p3 = scmp.lt.u32.totalorder %s751_s30, %s795_s3 }
  0x64   : > { %p507_p9 = scmp.lt.u32.totalorder %s505_s8, %s501_s11  ;;  %p509_p6 = scmp.lt.u32.totalorder %s501_s11, %s751_s30 }
  0x65   : > { %p503_p11 = pnand %p502_p10, %p808_p12 }
  0x66   : > { %p508_p2 = por %p507_p9, %p506_p3 }
  0x67   : > { %p504_p1 = pneg %p503_p11 }
  0x68   : > { %p510_p4 = por %p509_p6, %p508_p2 }
  0x6a   : > { %p511_p5 = pnand %p510_p4, %p504_p1 }
  0x6c   : > { %514 = shalt.err (!%p511_p5)
}
  0x6d   : > { %380 = dma.vmem_to_hbm [thread:$0]  (%p808_p12), %s746_s22, 256, %s751_s30, %s248_s26  }
  0x6e PF: > { %p394_p7 = scmp.ge.s32.totalorder %s557_s15, 2  ;;  %s274_s9 = sand.u32 1, %s545_s12  }
  0x6f   : > { %p809_p8 = scmp.ne.s32.totalorder %s801_s25, 0  ;;  %s275_s20 = scalar_lea.sflag [#allocation4], %s274_s9 }
  0x71   : > { %p390_p13 = pnand %p394_p7, %p809_p8 }
  0x73   : > { %540 = dma.done.wait (!%p390_p13), %s275_s20, 256  }
  0x74   : > { %542 = vsyncadd (!%p390_p13), %s275_s20, 4294967040  ;;  %p19_p0 = scmp.ge.s32.totalorder %s607_s18, 6   ;;  %s810_s12 = smov %s549_s13 }
  0x75   : > { %s811_s13 = smov %s553_s14  ;;  %s812_s14 = smov %s619_s21 }
  0x76   : > { %s813_s15 = smov %s607_s18  ;;  %21 = sbr.rel (!%p19_p0) target bundleno = 7 (0x7), region = 90 }
  0x7d   :  { %280 = vsyncpa [#allocation3], 1 }
  0x7e   :  { %282 = vsyncpa [#allocation3 + $0x1], 1 }
  0x7f   :  { %283 = vsyncpa [#allocation6], 1 }
  0x80   :  { %285 = vsyncpa [#allocation6 + $0x1], 1 }
  0x81   :  { %286 = vsyncpa [#allocation4], 1 }
  0x82   :  { %288 = vsyncpa [#allocation4 + $0x1], 1 }

</bundles_post_ra>
